<compile_context>
chip_gen: v6e
topology: v6e:2x2x1
jax: 0.10.0
libtpu: 0.0.40
codegen_flags: <defaults>
</compile_context>

<pallas_src>
import jax
import jax.numpy as jnp
from jax.experimental import pallas as pl
from jax.experimental.pallas import tpu as pltpu

SUBLANE = 8


def _round_up(n, m):
    return pl.cdiv(n, m) * m


def _softplus(v):
    # Matches F.softplus(beta=1, threshold=20). The where selects the linear
    # branch for v > 20; exp overflow in the dead branch is discarded.
    return jnp.where(v > 20.0, v, jnp.log1p(jnp.exp(v)))


def cond_model_kernel(x_ref, y_ref, e1_ref, e2_ref,
                      w1_ref, w2_ref, w3_ref, bias_ref, o_ref):
    TB = x_ref.shape[0]
    T, H = e1_ref.shape
    I = w3_ref.shape[1]

    bias = bias_ref[...]                 # (3, max(H, I)) f32, resident
    b1 = bias[0:1, :H]
    b2 = bias[1:2, :H]
    b3 = bias[2:3, :I]

    # Time-embedding gather as a tiny one-hot matmul (T is small, e1/e2 are
    # resident in VMEM) -- no (B, H) embedding stream from HBM.
    onehot = (y_ref[...] ==
              jax.lax.broadcasted_iota(jnp.int32, (TB, T), 1)
              ).astype(jnp.float32)                                     # (TB, T)
    t1 = jnp.dot(onehot, e1_ref[...], preferred_element_type=jnp.float32)  # (TB, H)
    t2 = jnp.dot(onehot, e2_ref[...], preferred_element_type=jnp.float32)  # (TB, H)

    wd = w1_ref.dtype  # bf16 weights; accumulate in f32 on the MXU
    h = jnp.dot(x_ref[...].astype(wd), w1_ref[...],
                preferred_element_type=jnp.float32) + b1
    h = _softplus(t1 * h)
    h = jnp.dot(h.astype(wd), w2_ref[...],
                preferred_element_type=jnp.float32) + b2
    h = _softplus(t2 * h)
    out = jnp.dot(h.astype(wd), w3_ref[...],
                  preferred_element_type=jnp.float32) + b3
    o_ref[...] = out.astype(o_ref.dtype)


def prep_params(params, compute_dtype=jnp.bfloat16):
    """One-time (per model, NOT per forward) packing / casting of parameters."""
    H = params["w1"].shape[1]
    I = params["w3"].shape[1]
    W = max(H, I)
    bias = jnp.zeros((3, W), jnp.float32)
    bias = bias.at[0, :H].set(params["b1"].reshape(-1))
    bias = bias.at[1, :H].set(params["b2"].reshape(-1))
    bias = bias.at[2, :I].set(params["b3"].reshape(-1))
    return dict(
        w1=params["w1"].astype(compute_dtype),
        w2=params["w2"].astype(compute_dtype),
        w3=params["w3"].astype(compute_dtype),
        e1=params["e1"].astype(jnp.float32),   # scale + softplus stay f32
        e2=params["e2"].astype(jnp.float32),
        bias=bias,
    )


def conditional_model(x, y, prepped, *, tb_max=1024):
    """x: (B, input_size) f32, y: (B,) int timestep indices, prepped: prep_params()."""
    B, I = x.shape
    T, H = prepped["e1"].shape
    W = prepped["bias"].shape[1]
    assert prepped["w1"].shape == (I, H) and prepped["w3"].shape == (H, I)

    # Batch tiling: >= 2 grid steps whenever B allows it (v7x dual-TC), rows a
    # multiple of the 8-sublane tile, capped by tb_max (amortizes per-step
    # overhead on v5e/v6e without blowing the VMEM budget).
    B8 = _round_up(B, SUBLANE)
    TB = min(tb_max, max(SUBLANE, _round_up(pl.cdiv(B8, 2), SUBLANE)))
    BP = _round_up(B, TB)
    grid = (BP // TB,)

    # Only the batch dim is ever padded (and only if B % TB != 0).
    yp = jnp.clip(y.astype(jnp.int32), 0, T - 1).reshape(B, 1)
    if BP != B:
        xp = jnp.pad(x, ((0, BP - B), (0, 0)))
        yp = jnp.pad(yp, ((0, BP - B), (0, 0)))
    else:
        xp = x

    # VMEM budget from the actual footprint (capped for v7x's 64 MiB VMEM).
    w_bytes = sum(int(prepped[k].size) * prepped[k].dtype.itemsize
                  for k in ("w1", "w2", "w3", "e1", "e2", "bias"))
    stream_bytes = TB * (2 * I * 4 + 4)          # x + out (f32) + y (int32) per step
    need = 2 * stream_bytes + 2 * w_bytes + (4 << 20)
    vmem_limit = int(min(max(need, 16 << 20), 64 << 20))

    operands = (xp, yp, prepped["e1"], prepped["e2"],
                prepped["w1"], prepped["w2"], prepped["w3"], prepped["bias"])

    def run(single_buffer_resident):
        def stream(cols):
            return pl.BlockSpec((TB, cols), lambda i: (i, 0))

        def resident(shape):
            if single_buffer_resident:
                # Constant index map -> one VMEM copy is enough.
                return pl.BlockSpec(shape, lambda i: (0, 0),
                                    pipeline_mode=pl.Buffered(1))
            return pl.BlockSpec(shape, lambda i: (0, 0))

        return pl.pallas_call(
            cond_model_kernel,
            out_shape=jax.ShapeDtypeStruct((BP, I), jnp.float32),
            grid=grid,
            in_specs=[
                stream(I),          # x
                stream(1),          # y (int32 column)
                resident((T, H)),   # e1
                resident((T, H)),   # e2
                resident((I, H)),   # w1 (bf16)
                resident((H, H)),   # w2 (bf16)
                resident((H, I)),   # w3 (bf16)
                resident((3, W)),   # packed biases (f32)
            ],
            out_specs=stream(I),
            compiler_params=pltpu.CompilerParams(
                # batch axis is embarrassingly parallel -> both v7x TCs
                dimension_semantics=("parallel",),
                vmem_limit_bytes=vmem_limit,
            ),
        )(*operands)

    try:
        out_p = run(True)
    except Exception:
        # pl.Buffered(1) / pipeline_mode not supported on this jax build:
        # fall back to default double-buffered resident blocks.
        out_p = run(False)

    return out_p[:B, :I]


def init_params(key, timesteps, input_size, hidden_size):
    """Deterministic init mimicking the PyTorch module's shapes.

    nn.Linear(in, out): weight (out, in) U(-1/sqrt(in), 1/sqrt(in)), bias same
    range.  Stored transposed as (in, out).  nn.Embedding(T, H).uniform_(): U[0,1).
    """
    ks = jax.random.split(key, 8)

    def lin(kw, kb, fin, fout):
        bound = 1.0 / jnp.sqrt(jnp.float32(fin))
        w = jax.random.uniform(kw, (fin, fout), jnp.float32, -bound, bound)
        b = jax.random.uniform(kb, (1, fout), jnp.float32, -bound, bound)
        return w, b

    w1, b1 = lin(ks[0], ks[1], input_size, hidden_size)
    w2, b2 = lin(ks[2], ks[3], hidden_size, hidden_size)
    w3, b3 = lin(ks[4], ks[5], hidden_size, input_size)
    e1 = jax.random.uniform(ks[6], (timesteps, hidden_size), jnp.float32, 0.0, 1.0)
    e2 = jax.random.uniform(ks[7], (timesteps, hidden_size), jnp.float32, 0.0, 1.0)
    return dict(w1=w1, b1=b1, e1=e1, w2=w2, b2=b2, e2=e2, w3=w3, b3=b3)


def reference_f32(x, y, p):
    """Pure f32 forward with PyTorch softplus semantics."""
    def sp(v):
        return jnp.where(v > 20.0, v, jnp.log1p(jnp.exp(jnp.minimum(v, 20.0))))
    h = sp(p["e1"][y] * (x @ p["w1"] + p["b1"]))
    h = sp(p["e2"][y] * (h @ p["w2"] + p["b2"]))
    return h @ p["w3"] + p["b3"]


def reference_mixed(x, y, p):
    """Same forward but with the kernel's bf16 weight / matmul-LHS casts."""
    def sp(v):
        return jnp.where(v > 20.0, v, jnp.log1p(jnp.exp(jnp.minimum(v, 20.0))))

    def mm(a, w):
        return jnp.dot(a.astype(jnp.bfloat16), w.astype(jnp.bfloat16),
                       preferred_element_type=jnp.float32)

    h = sp(p["e1"][y] * (mm(x, p["w1"]) + p["b1"]))
    h = sp(p["e2"][y] * (mm(h, p["w2"]) + p["b2"]))
    return mm(h, p["w3"]) + p["b3"]


if __name__ == "__main__":
    timesteps, input_size, hidden_size = 10, 16, 32
    B = 24  # exercises a 2-step batch grid and batch-dim padding (24 -> 32)

    key = jax.random.PRNGKey(0)
    kx, ky, kp = jax.random.split(key, 3)
    x = jax.random.normal(kx, (B, input_size), jnp.float32)
    y = jax.random.randint(ky, (B,), 0, timesteps, jnp.int32)

    params = init_params(kp, timesteps, input_size, hidden_size)
    prepped = prep_params(params)            # one-time bf16 cast + bias packing

    out = conditional_model(x, y, prepped)
    out = jax.block_until_ready(out)

    assert out.shape == (B, input_size)
    # Tight check vs. a reference using the same bf16 casts the kernel applies.
    assert jnp.allclose(out, reference_mixed(x, y, params), atol=1e-4, rtol=1e-4)
    # Loose check vs. the pure-f32 PyTorch-semantics reference.
    assert jnp.allclose(out, reference_f32(x, y, params), atol=5e-2, rtol=5e-2)
    print("KERNEL_OK")
</pallas_src>

<mosaic_0001>
module attributes {stable_mosaic.version = 11 : i64} {
  func.func @cond_model_kernel(%arg0: i32, %arg1: memref<16x16xf32, #tpu.memory_space<vmem>>, %arg2: memref<16x1xi32, #tpu.memory_space<vmem>>, %arg3: memref<10x32xf32, #tpu.memory_space<vmem>>, %arg4: memref<10x32xf32, #tpu.memory_space<vmem>>, %arg5: memref<16x32xbf16, #tpu.memory_space<vmem>>, %arg6: memref<32x32xbf16, #tpu.memory_space<vmem>>, %arg7: memref<32x16xbf16, #tpu.memory_space<vmem>>, %arg8: memref<3x32xf32, #tpu.memory_space<vmem>>, %arg9: memref<16x16xf32, #tpu.memory_space<vmem>>) attributes {dimension_semantics = [#tpu.dimension_semantics<parallel>], iteration_bounds = array<i64: 2>, scalar_prefetch = 0 : i64, scratch_operands = 0 : i64, tpu.core_type = #tpu.core_type<tc>, window_params = [{transform_indices = @transform_0, window_bounds = array<i64: 16, 16>}, {transform_indices = @transform_1, window_bounds = array<i64: 16, 1>}, {pipeline_mode = #tpu.pipeline_mode<synchronous>, transform_indices = @transform_2, window_bounds = array<i64: 10, 32>}, {pipeline_mode = #tpu.pipeline_mode<synchronous>, transform_indices = @transform_3, window_bounds = array<i64: 10, 32>}, {pipeline_mode = #tpu.pipeline_mode<synchronous>, transform_indices = @transform_4, window_bounds = array<i64: 16, 32>}, {pipeline_mode = #tpu.pipeline_mode<synchronous>, transform_indices = @transform_5, window_bounds = array<i64: 32, 32>}, {pipeline_mode = #tpu.pipeline_mode<synchronous>, transform_indices = @transform_6, window_bounds = array<i64: 32, 16>}, {pipeline_mode = #tpu.pipeline_mode<synchronous>, transform_indices = @transform_7, window_bounds = array<i64: 3, 32>}, {transform_indices = @transform_8, window_bounds = array<i64: 16, 16>}]} {
    %c0 = arith.constant 0 : index
    %c0_0 = arith.constant 0 : index
    %0 = vector.load %arg8[%c0, %c0_0] : memref<3x32xf32, #tpu.memory_space<vmem>>, vector<3x32xf32>
    %1 = vector.extract_strided_slice %0 {offsets = [0, 0], sizes = [1, 32], strides = [1, 1]} : vector<3x32xf32> to vector<1x32xf32>
    %2 = vector.extract_strided_slice %0 {offsets = [1, 0], sizes = [1, 32], strides = [1, 1]} : vector<3x32xf32> to vector<1x32xf32>
    %3 = vector.extract_strided_slice %0 {offsets = [2, 0], sizes = [1, 16], strides = [1, 1]} : vector<3x32xf32> to vector<1x16xf32>
    %c0_1 = arith.constant 0 : index
    %c0_2 = arith.constant 0 : index
    %4 = vector.load %arg2[%c0_1, %c0_2] : memref<16x1xi32, #tpu.memory_space<vmem>>, vector<16x1xi32>
    %5 = tpu.iota {dimensions = array<i32: 1>} : vector<16x10xi32>
    %6 = vector.broadcast %4 : vector<16x1xi32> to vector<16x10xi32>
    %7 = arith.cmpi eq, %6, %5 : vector<16x10xi32>
    %8 = arith.extui %7 : vector<16x10xi1> to vector<16x10xi32>
    %9 = arith.sitofp %8 : vector<16x10xi32> to vector<16x10xf32>
    %c0_3 = arith.constant 0 : index
    %c0_4 = arith.constant 0 : index
    %10 = vector.load %arg3[%c0_3, %c0_4] : memref<10x32xf32, #tpu.memory_space<vmem>>, vector<10x32xf32>
    %cst = arith.constant dense<0.000000e+00> : vector<16x32xf32>
    %11 = tpu.matmul %9, %10, %cst {dimension_numbers = #tpu.dot_dimension_numbers<[1], [0], [0], [1], [0, 0, 1, 1], [], []>} : vector<16x10xf32>, vector<10x32xf32>, vector<16x32xf32> -> vector<16x32xf32>
    %c0_5 = arith.constant 0 : index
    %c0_6 = arith.constant 0 : index
    %12 = vector.load %arg4[%c0_5, %c0_6] : memref<10x32xf32, #tpu.memory_space<vmem>>, vector<10x32xf32>
    %cst_7 = arith.constant dense<0.000000e+00> : vector<16x32xf32>
    %13 = tpu.matmul %9, %12, %cst_7 {dimension_numbers = #tpu.dot_dimension_numbers<[1], [0], [0], [1], [0, 0, 1, 1], [], []>} : vector<16x10xf32>, vector<10x32xf32>, vector<16x32xf32> -> vector<16x32xf32>
    %c0_8 = arith.constant 0 : index
    %c0_9 = arith.constant 0 : index
    %14 = vector.load %arg1[%c0_8, %c0_9] : memref<16x16xf32, #tpu.memory_space<vmem>>, vector<16x16xf32>
    %15 = arith.truncf %14 : vector<16x16xf32> to vector<16x16xbf16>
    %c0_10 = arith.constant 0 : index
    %c0_11 = arith.constant 0 : index
    %16 = vector.load %arg5[%c0_10, %c0_11] : memref<16x32xbf16, #tpu.memory_space<vmem>>, vector<16x32xbf16>
    %cst_12 = arith.constant dense<0.000000e+00> : vector<16x32xf32>
    %17 = tpu.matmul %15, %16, %cst_12 {dimension_numbers = #tpu.dot_dimension_numbers<[1], [0], [0], [1], [0, 0, 1, 1], [], []>} : vector<16x16xbf16>, vector<16x32xbf16>, vector<16x32xf32> -> vector<16x32xf32>
    %18 = vector.broadcast %1 : vector<1x32xf32> to vector<16x32xf32>
    %19 = arith.addf %17, %18 : vector<16x32xf32>
    %20 = arith.mulf %11, %19 : vector<16x32xf32>
    %cst_13 = arith.constant 2.000000e+01 : f32
    %21 = vector.broadcast %cst_13 : f32 to vector<16x32xf32>
    %22 = arith.cmpf ogt, %20, %21 : vector<16x32xf32>
    %23 = math.exp %20 : vector<16x32xf32>
    %24 = math.log1p %23 : vector<16x32xf32>
    %25 = arith.select %22, %20, %24 : vector<16x32xi1>, vector<16x32xf32>
    %26 = arith.truncf %25 : vector<16x32xf32> to vector<16x32xbf16>
    %c0_14 = arith.constant 0 : index
    %c0_15 = arith.constant 0 : index
    %27 = vector.load %arg6[%c0_14, %c0_15] : memref<32x32xbf16, #tpu.memory_space<vmem>>, vector<32x32xbf16>
    %cst_16 = arith.constant dense<0.000000e+00> : vector<16x32xf32>
    %28 = tpu.matmul %26, %27, %cst_16 {dimension_numbers = #tpu.dot_dimension_numbers<[1], [0], [0], [1], [0, 0, 1, 1], [], []>} : vector<16x32xbf16>, vector<32x32xbf16>, vector<16x32xf32> -> vector<16x32xf32>
    %29 = vector.broadcast %2 : vector<1x32xf32> to vector<16x32xf32>
    %30 = arith.addf %28, %29 : vector<16x32xf32>
    %31 = arith.mulf %13, %30 : vector<16x32xf32>
    %cst_17 = arith.constant 2.000000e+01 : f32
    %32 = vector.broadcast %cst_17 : f32 to vector<16x32xf32>
    %33 = arith.cmpf ogt, %31, %32 : vector<16x32xf32>
    %34 = math.exp %31 : vector<16x32xf32>
    %35 = math.log1p %34 : vector<16x32xf32>
    %36 = arith.select %33, %31, %35 : vector<16x32xi1>, vector<16x32xf32>
    %37 = arith.truncf %36 : vector<16x32xf32> to vector<16x32xbf16>
    %c0_18 = arith.constant 0 : index
    %c0_19 = arith.constant 0 : index
    %38 = vector.load %arg7[%c0_18, %c0_19] : memref<32x16xbf16, #tpu.memory_space<vmem>>, vector<32x16xbf16>
    %cst_20 = arith.constant dense<0.000000e+00> : vector<16x16xf32>
    %39 = tpu.matmul %37, %38, %cst_20 {dimension_numbers = #tpu.dot_dimension_numbers<[1], [0], [0], [1], [0, 0, 1, 1], [], []>} : vector<16x32xbf16>, vector<32x16xbf16>, vector<16x16xf32> -> vector<16x16xf32>
    %40 = vector.broadcast %3 : vector<1x16xf32> to vector<16x16xf32>
    %41 = arith.addf %39, %40 : vector<16x16xf32>
    %c0_21 = arith.constant 0 : index
    %c0_22 = arith.constant 0 : index
    %42 = vector.load %arg9[%c0_21, %c0_22] : memref<16x16xf32, #tpu.memory_space<vmem>>, vector<16x16xf32>
    tpu.vector_store %arg9[%c0_21, %c0_22], %41 {strides = array<i32>} : memref<16x16xf32, #tpu.memory_space<vmem>>, vector<16x16xf32>,
    return
  }
  func.func @transform_0(%arg0: i32) -> (i32, i32) {
    %c0_i32 = arith.constant 0 : i32
    %c0_i32_0 = arith.constant 0 : i32
    return %arg0, %c0_i32 : i32, i32
  }
  func.func @transform_1(%arg0: i32) -> (i32, i32) {
    %c0_i32 = arith.constant 0 : i32
    %c0_i32_0 = arith.constant 0 : i32
    return %arg0, %c0_i32 : i32, i32
  }
  func.func @transform_2(%arg0: i32) -> (i32, i32) {
    %c0_i32 = arith.constant 0 : i32
    %c0_i32_0 = arith.constant 0 : i32
    %c0_i32_1 = arith.constant 0 : i32
    return %c0_i32, %c0_i32_0 : i32, i32
  }
  func.func @transform_3(%arg0: i32) -> (i32, i32) {
    %c0_i32 = arith.constant 0 : i32
    %c0_i32_0 = arith.constant 0 : i32
    %c0_i32_1 = arith.constant 0 : i32
    return %c0_i32, %c0_i32_0 : i32, i32
  }
  func.func @transform_4(%arg0: i32) -> (i32, i32) {
    %c0_i32 = arith.constant 0 : i32
    %c0_i32_0 = arith.constant 0 : i32
    %c0_i32_1 = arith.constant 0 : i32
    return %c0_i32, %c0_i32_0 : i32, i32
  }
  func.func @transform_5(%arg0: i32) -> (i32, i32) {
    %c0_i32 = arith.constant 0 : i32
    %c0_i32_0 = arith.constant 0 : i32
    %c0_i32_1 = arith.constant 0 : i32
    return %c0_i32, %c0_i32_0 : i32, i32
  }
  func.func @transform_6(%arg0: i32) -> (i32, i32) {
    %c0_i32 = arith.constant 0 : i32
    %c0_i32_0 = arith.constant 0 : i32
    %c0_i32_1 = arith.constant 0 : i32
    return %c0_i32, %c0_i32_0 : i32, i32
  }
  func.func @transform_7(%arg0: i32) -> (i32, i32) {
    %c0_i32 = arith.constant 0 : i32
    %c0_i32_0 = arith.constant 0 : i32
    %c0_i32_1 = arith.constant 0 : i32
    return %c0_i32, %c0_i32_0 : i32, i32
  }
  func.func @transform_8(%arg0: i32) -> (i32, i32) {
    %c0_i32 = arith.constant 0 : i32
    %c0_i32_0 = arith.constant 0 : i32
    return %arg0, %c0_i32 : i32, i32
  }
}

module attributes {stable_mosaic.version = 11 : i64} {
  func.func @cond_model_kernel(%arg0: i32, %arg1: memref<16x16xf32, #tpu.memory_space<vmem>>, %arg2: memref<16x1xi32, #tpu.memory_space<vmem>>, %arg3: memref<10x32xf32, #tpu.memory_space<vmem>>, %arg4: memref<10x32xf32, #tpu.memory_space<vmem>>, %arg5: memref<16x32xbf16, #tpu.memory_space<vmem>>, %arg6: memref<32x32xbf16, #tpu.memory_space<vmem>>, %arg7: memref<32x16xbf16, #tpu.memory_space<vmem>>, %arg8: memref<3x32xf32, #tpu.memory_space<vmem>>, %arg9: memref<16x16xf32, #tpu.memory_space<vmem>>) attributes {dimension_semantics = [#tpu.dimension_semantics<parallel>], iteration_bounds = array<i64: 2>, scalar_prefetch = 0 : i64, scratch_operands = 0 : i64, tpu.core_type = #tpu.core_type<tc>, window_params = [{transform_indices = @transform_0, window_bounds = array<i64: 16, 16>}, {transform_indices = @transform_1, window_bounds = array<i64: 16, 1>}, {pipeline_mode = #tpu.pipeline_mode<synchronous>, transform_indices = @transform_2, window_bounds = array<i64: 10, 32>}, {pipeline_mode = #tpu.pipeline_mode<synchronous>, transform_indices = @transform_3, window_bounds = array<i64: 10, 32>}, {pipeline_mode = #tpu.pipeline_mode<synchronous>, transform_indices = @transform_4, window_bounds = array<i64: 16, 32>}, {pipeline_mode = #tpu.pipeline_mode<synchronous>, transform_indices = @transform_5, window_bounds = array<i64: 32, 32>}, {pipeline_mode = #tpu.pipeline_mode<synchronous>, transform_indices = @transform_6, window_bounds = array<i64: 32, 16>}, {pipeline_mode = #tpu.pipeline_mode<synchronous>, transform_indices = @transform_7, window_bounds = array<i64: 3, 32>}, {transform_indices = @transform_8, window_bounds = array<i64: 16, 16>}]} {
    %c0 = arith.constant 0 : index
    %c0_0 = arith.constant 0 : index
    %0 = vector.load %arg8[%c0, %c0_0] : memref<3x32xf32, #tpu.memory_space<vmem>>, vector<3x32xf32>
    %1 = vector.extract_strided_slice %0 {offsets = [0, 0], sizes = [1, 32], strides = [1, 1]} : vector<3x32xf32> to vector<1x32xf32>
    %2 = vector.extract_strided_slice %0 {offsets = [1, 0], sizes = [1, 32], strides = [1, 1]} : vector<3x32xf32> to vector<1x32xf32>
    %3 = vector.extract_strided_slice %0 {offsets = [2, 0], sizes = [1, 16], strides = [1, 1]} : vector<3x32xf32> to vector<1x16xf32>
    %c0_1 = arith.constant 0 : index
    %c0_2 = arith.constant 0 : index
    %4 = vector.load %arg2[%c0_1, %c0_2] : memref<16x1xi32, #tpu.memory_space<vmem>>, vector<16x1xi32>
    %5 = tpu.iota {dimensions = array<i32: 1>} : vector<16x10xi32>
    %6 = vector.broadcast %4 : vector<16x1xi32> to vector<16x10xi32>
    %7 = arith.cmpi eq, %6, %5 : vector<16x10xi32>
    %8 = arith.extui %7 : vector<16x10xi1> to vector<16x10xi32>
    %9 = arith.sitofp %8 : vector<16x10xi32> to vector<16x10xf32>
    %c0_3 = arith.constant 0 : index
    %c0_4 = arith.constant 0 : index
    %10 = vector.load %arg3[%c0_3, %c0_4] : memref<10x32xf32, #tpu.memory_space<vmem>>, vector<10x32xf32>
    %cst = arith.constant dense<0.000000e+00> : vector<16x32xf32>
    %11 = tpu.matmul %9, %10, %cst {dimension_numbers = #tpu.dot_dimension_numbers<[1], [0], [0], [1], [0, 0, 1, 1], [], []>} : vector<16x10xf32>, vector<10x32xf32>, vector<16x32xf32> -> vector<16x32xf32>
    %c0_5 = arith.constant 0 : index
    %c0_6 = arith.constant 0 : index
    %12 = vector.load %arg4[%c0_5, %c0_6] : memref<10x32xf32, #tpu.memory_space<vmem>>, vector<10x32xf32>
    %cst_7 = arith.constant dense<0.000000e+00> : vector<16x32xf32>
    %13 = tpu.matmul %9, %12, %cst_7 {dimension_numbers = #tpu.dot_dimension_numbers<[1], [0], [0], [1], [0, 0, 1, 1], [], []>} : vector<16x10xf32>, vector<10x32xf32>, vector<16x32xf32> -> vector<16x32xf32>
    %c0_8 = arith.constant 0 : index
    %c0_9 = arith.constant 0 : index
    %14 = vector.load %arg1[%c0_8, %c0_9] : memref<16x16xf32, #tpu.memory_space<vmem>>, vector<16x16xf32>
    %15 = arith.truncf %14 : vector<16x16xf32> to vector<16x16xbf16>
    %c0_10 = arith.constant 0 : index
    %c0_11 = arith.constant 0 : index
    %16 = vector.load %arg5[%c0_10, %c0_11] : memref<16x32xbf16, #tpu.memory_space<vmem>>, vector<16x32xbf16>
    %cst_12 = arith.constant dense<0.000000e+00> : vector<16x32xf32>
    %17 = tpu.matmul %15, %16, %cst_12 {dimension_numbers = #tpu.dot_dimension_numbers<[1], [0], [0], [1], [0, 0, 1, 1], [], []>} : vector<16x16xbf16>, vector<16x32xbf16>, vector<16x32xf32> -> vector<16x32xf32>
    %18 = vector.broadcast %1 : vector<1x32xf32> to vector<16x32xf32>
    %19 = arith.addf %17, %18 : vector<16x32xf32>
    %20 = arith.mulf %11, %19 : vector<16x32xf32>
    %cst_13 = arith.constant 2.000000e+01 : f32
    %21 = vector.broadcast %cst_13 : f32 to vector<16x32xf32>
    %22 = arith.cmpf ogt, %20, %21 : vector<16x32xf32>
    %23 = math.exp %20 : vector<16x32xf32>
    %24 = math.log1p %23 : vector<16x32xf32>
    %25 = arith.select %22, %20, %24 : vector<16x32xi1>, vector<16x32xf32>
    %26 = arith.truncf %25 : vector<16x32xf32> to vector<16x32xbf16>
    %c0_14 = arith.constant 0 : index
    %c0_15 = arith.constant 0 : index
    %27 = vector.load %arg6[%c0_14, %c0_15] : memref<32x32xbf16, #tpu.memory_space<vmem>>, vector<32x32xbf16>
    %cst_16 = arith.constant dense<0.000000e+00> : vector<16x32xf32>
    %28 = tpu.matmul %26, %27, %cst_16 {dimension_numbers = #tpu.dot_dimension_numbers<[1], [0], [0], [1], [0, 0, 1, 1], [], []>} : vector<16x32xbf16>, vector<32x32xbf16>, vector<16x32xf32> -> vector<16x32xf32>
    %29 = vector.broadcast %2 : vector<1x32xf32> to vector<16x32xf32>
    %30 = arith.addf %28, %29 : vector<16x32xf32>
    %31 = arith.mulf %13, %30 : vector<16x32xf32>
    %cst_17 = arith.constant 2.000000e+01 : f32
    %32 = vector.broadcast %cst_17 : f32 to vector<16x32xf32>
    %33 = arith.cmpf ogt, %31, %32 : vector<16x32xf32>
    %34 = math.exp %31 : vector<16x32xf32>
    %35 = math.log1p %34 : vector<16x32xf32>
    %36 = arith.select %33, %31, %35 : vector<16x32xi1>, vector<16x32xf32>
    %37 = arith.truncf %36 : vector<16x32xf32> to vector<16x32xbf16>
    %c0_18 = arith.constant 0 : index
    %c0_19 = arith.constant 0 : index
    %38 = vector.load %arg7[%c0_18, %c0_19] : memref<32x16xbf16, #tpu.memory_space<vmem>>, vector<32x16xbf16>
    %cst_20 = arith.constant dense<0.000000e+00> : vector<16x16xf32>
    %39 = tpu.matmul %37, %38, %cst_20 {dimension_numbers = #tpu.dot_dimension_numbers<[1], [0], [0], [1], [0, 0, 1, 1], [], []>} : vector<16x32xbf16>, vector<32x16xbf16>, vector<16x16xf32> -> vector<16x16xf32>
    %40 = vector.broadcast %3 : vector<1x16xf32> to vector<16x16xf32>
    %41 = arith.addf %39, %40 : vector<16x16xf32>
    %c0_21 = arith.constant 0 : index
    %c0_22 = arith.constant 0 : index
    %42 = vector.load %arg9[%c0_21, %c0_22] : memref<16x16xf32, #tpu.memory_space<vmem>>, vector<16x16xf32>
    tpu.vector_store %arg9[%c0_21, %c0_22], %41 {strides = array<i32>} : memref<16x16xf32, #tpu.memory_space<vmem>>, vector<16x16xf32>,
    return
  }
  func.func @transform_0(%arg0: i32) -> (i32, i32) {
    %c0_i32 = arith.constant 0 : i32
    %c0_i32_0 = arith.constant 0 : i32
    return %arg0, %c0_i32 : i32, i32
  }
  func.func @transform_1(%arg0: i32) -> (i32, i32) {
    %c0_i32 = arith.constant 0 : i32
    %c0_i32_0 = arith.constant 0 : i32
    return %arg0, %c0_i32 : i32, i32
  }
  func.func @transform_2(%arg0: i32) -> (i32, i32) {
    %c0_i32 = arith.constant 0 : i32
    %c0_i32_0 = arith.constant 0 : i32
    %c0_i32_1 = arith.constant 0 : i32
    return %c0_i32, %c0_i32_0 : i32, i32
  }
  func.func @transform_3(%arg0: i32) -> (i32, i32) {
    %c0_i32 = arith.constant 0 : i32
    %c0_i32_0 = arith.constant 0 : i32
    %c0_i32_1 = arith.constant 0 : i32
    return %c0_i32, %c0_i32_0 : i32, i32
  }
  func.func @transform_4(%arg0: i32) -> (i32, i32) {
    %c0_i32 = arith.constant 0 : i32
    %c0_i32_0 = arith.constant 0 : i32
    %c0_i32_1 = arith.constant 0 : i32
    return %c0_i32, %c0_i32_0 : i32, i32
  }
  func.func @transform_5(%arg0: i32) -> (i32, i32) {
    %c0_i32 = arith.constant 0 : i32
    %c0_i32_0 = arith.constant 0 : i32
    %c0_i32_1 = arith.constant 0 : i32
    return %c0_i32, %c0_i32_0 : i32, i32
  }
  func.func @transform_6(%arg0: i32) -> (i32, i32) {
    %c0_i32 = arith.constant 0 : i32
    %c0_i32_0 = arith.constant 0 : i32
    %c0_i32_1 = arith.constant 0 : i32
    return %c0_i32, %c0_i32_0 : i32, i32
  }
  func.func @transform_7(%arg0: i32) -> (i32, i32) {
    %c0_i32 = arith.constant 0 : i32
    %c0_i32_0 = arith.constant 0 : i32
    %c0_i32_1 = arith.constant 0 : i32
    return %c0_i32, %c0_i32_0 : i32, i32
  }
  func.func @transform_8(%arg0: i32) -> (i32, i32) {
    %c0_i32 = arith.constant 0 : i32
    %c0_i32_0 = arith.constant 0 : i32
    return %arg0, %c0_i32 : i32, i32
  }
}

</mosaic_0001>

<bundles_post_ra>
// kernel: tpu_custom_call.1
= control target key start
LH: loop header
LB: loop body
LE: loop exit
PB: predicated region body
PF: predicated region fallthrough
CT: control target
= control target key end

     0   :  { %s1004_s27 = smov 0   ;;  %s1084_s0 = inlined_call_operand.vmem [shape: f32[32,16], index: 0, kind: input, shape index: {}]   ;;  %s1085_s1 = inlined_call_operand.vmem [shape: s32[32,1], index: 1, kind: input, shape index: {}]   ;;  %s1086_s2 = inlined_call_operand.vmem [shape: f32[10,32], index: 2, kind: input, shape index: {}]   ;;  %s1087_s3 = inlined_call_operand.vmem [shape: f32[10,32], index: 3, kind: input, shape index: {}]   ;;  %s1088_s4 = inlined_call_operand.vmem [shape: bf16[16,32], index: 4, kind: input, shape index: {}]   ;;  %s1089_s5 = inlined_call_operand.vmem [shape: bf16[32,32], index: 5, kind: input, shape index: {}]   ;;  %s1090_s6 = inlined_call_operand.vmem [shape: bf16[32,16], index: 6, kind: input, shape index: {}]   ;;  %s1091_s7 = inlined_call_operand.vmem [shape: f32[3,32], index: 7, kind: input, shape index: {}]   ;;  %s1092_s8 = inlined_call_operand.vmem [shape: f32[32,16], index: 8, kind: output, shape index: {}]  }
   0x1 LB: > { %s834_s28 = sadd.s32 4294967295, %s954_s27   ;;  %p838_p0 = scmp.ge.s32.totalorder %s954_s27, 1  ;;  %s954_s27 = sphi %s1004_s27, %s18_s27  }
   0x2   : > { %p274_p1 = scmp.lt.s32.totalorder %s954_s27, 3 }
   0x4   : > { %p275_p2 = pnand %p838_p0, %p274_p1 }
   0x5   : > { %s839_s29 = sshll.u32 (!%p275_p2), %s834_s28, 1 }
   0x6   : > { %278 = sbr.rel (%p275_p2) target bundleno = 827 (0x33b), region = 52  ;;  %p314_p3 = scmp.lt.s32.totalorder (!%p275_p2), %s839_s29, 3 }
   0xb   : > { %v956_v0 = vmov 0   ;;  %s1094_s29 = smov (!%p314_p3, %s839_s29), 3  ;;  %v350_v1 = vld [vmem:[%s1086_s2 + $0x8] sm:$0x3]  ;;  %vm358_vm0 = vcmask 1041408   ;;  %v349_v3 = vld [vmem:[%s1086_s2] sm:$0xff]  ;;  %v335_v8 = vlaneseq }
   0xc   : > { %926 = vset.pattern.permute.xlu0 %v956_v0  ;;  %s1015_s10 = sshll.u32 %s1094_s29, 3  ;;  %879 = vmatprep.subr.msk.mxu0 %vm358_vm0, %v350_v1  ;;  %v438_v2 = vld [vmem:[%s1087_s3 + $0x8] sm:$0x3]  ;;  %v437_v5 = vld [vmem:[%s1087_s3] sm:$0xff]  ;;  %v957_v7 = vmov 0.0   ;;  %vm351_vm1 = vcmask 80896  }
   0xd   : > { %s323_s15 = scalar_lea.vmem %s1085_s1, %s1015_s10  ;;  %880 = vmatpush3.msk.msra.mxu0 %vm358_vm0, %v350_v1  ;;  %886 = vmatprep.subr.msk.mxu1 %vm358_vm0, %v438_v2  ;;  %v336_v9 = vand.u32 127, %v335_v8  ;;  %s317_s22 = scalar_lea.vmem %s1084_s0, %s1015_s10  ;;  %v927_v15 = vld [vmem:[%s1088_s4] sm:$0xff]   ;;  %vm958_vm4 = vmmov 0   ;;  %vm532_vm5 = vcmask 130048   ;;  %v928_v18 = vld [vmem:[%s1089_s5 + $0x8] sm:$0xff]   ;;  %v1053_v20 = vshrl.u32 %v335_v8, 7 }
   0xe   : > { %v333_v4 = vld [vmem:[%s323_s15] sm:$0xff]  ;;  %881 = vmatprep.subr.mxu0 %v349_v3  ;;  %887 = vmatpush3.msk.msra.mxu1 %vm358_vm0, %v438_v2  ;;  %v334_v6 = vld [vmem:[%s323_s15 + $0x8] sm:$0xff]  ;;  %vm626_vm10 = vcmask 261120   ;;  %s329_s17 = scalar_lea.vmem %s1092_s8, %s1015_s10 }
   0xf   : > { %338 = vperm.xlu0 %926, %v333_v4   ;;  %882 = vmatpush3.msra.mxu0 %v349_v3  ;;  %v517_v12 = vld [vmem:[%s317_s22] sm:$0xff]  ;;  %v518_v13 = vld [vmem:[%s317_s22 + $0x8] sm:$0xff]  ;;  %v524_v21 = vsub.s32 0, %v1053_v20  ;;  %v612_v59 = vsub.s32 1, %v1053_v20 }
  0x10   : > { %888 = vmatprep.subr.mxu1 %v437_v5  ;;  %893 = vmatprep.subr.bf16.mxu0 %v957_v7  ;;  %v519_v17 = vpack.c.bf16 %v518_v13, %v517_v12  ;;  %v929_v19 = vld [vmem:[%s1089_s5] sm:$0xff]   ;;  %v930_v57 = vld [vmem:[%s1090_s6 + $0x8] sm:$0xff]  }
  0x11   : > { %889 = vmatpush3.msra.mxu1 %v437_v5  ;;  %v1059_v22 = vld [vmem:[%s1091_s7] sm:$0x7] }
  0x12   : > { %899 = vmatprep.subr.bf16.mxu1 %v957_v7  ;;  %v525_v24 = vrot.slane %v1059_v22, %v524_v21  ;;  %v931_v58 = vld [vmem:[%s1090_s6] sm:$0xff]   ;;  %v613_v61 = vrot.slane %v1059_v22, %v612_v59 }
  0x13   : > { %341 = vperm.xlu0 %926, %v334_v6  }
  0x8a   : > { %v339_v10 = vpop.permute.xlu0 %338 }
  0x8b   : > { %vm343_vm2 = vcmp.eq.s32.totalorder %v339_v10, %v336_v9 }
  0x8c   : > { %v845_v11 = vsel %vm343_vm2, 1.0, %v957_v7 }
  0x8d   : > { %883 = vmatprep.mubr.msk.f32.mxu0 %vm351_vm1, %v845_v11  ;;  %890 = vmatprep.mubr.msk.f32.mxu1 %vm351_vm1, %v845_v11 }
  0x8e   : > { %v342_v14 = vpop.permute.xlu0 %341 }
  0x8f   : > { %vm344_vm3 = vcmp.eq.s32.totalorder %v342_v14, %v336_v9 }
  0x90   : > { %v846_v16 = vsel %vm344_vm3, 1.0, %v957_v7 }
  0x91   : > { %884 = vmatmul.mubr.msk.f32.vlgmr.msra.gmra.mxu0 %vm351_vm1, %v846_v16  ;;  %891 = vmatmul.mubr.msk.f32.vlgmr.msra.gmra.mxu1 %vm351_vm1, %v846_v16 }
  0x92   : > { %894 = vmatpush3.bf16.msra.mxu0 %v927_v15  ;;  %895 = vmatprep.mubr.msk.bf16.mxu0 %vm958_vm4, %v957_v7 }
  0x93   : > { %903 = vmatprep.mubr.msk.bf16.mxu1 %vm958_vm4, %v957_v7  ;;  %907 = vmatprep.subr.bf16.mxu0 %v957_v7 }
  0x94   : > { %900 = vmatpush3.bf16.msra.mxu1 %v928_v18 }
  0x95   : > { %896 = vmatmul.mubr.msk.bf16.vlgmr.msra.gmra.mxu0 %vm532_vm5, %v519_v17  ;;  %901 = vmatprep.subr.bf16.mxu1 %v957_v7 }
  0x96   : > { %911 = vmatprep.mubr.msk.bf16.mxu0 %vm958_vm4, %v957_v7  ;;  %908 = vmatpush3.bf16.msra.mxu0 %v930_v57 }
  0x97   : > { %909 = vmatprep.subr.bf16.mxu0 %v957_v7 }
  0x98   : > { %902 = vmatpush3.bf16.msra.mxu1 %v929_v19 }
  0x9a   : > { %910 = vmatpush3.bf16.msra.mxu0 %v931_v58 }
 0x151   : > { %v885_v23 = vpop.f32.mrf.mxu0  ;;  %v892_v60 = vpop.f32.mrf.mxu1 }
 0x153   : > { %v428_v25 = vpop.f32.mrf.mxu0  ;;  %v508_v62 = vpop.f32.mrf.mxu1 }
 0x155   : > { %v570_v26 = vpop.f32.mrf.mxu0 }
 0x156   : > { %v571_v27 = vadd.f32 %v570_v26, %v525_v24 }
 0x157   : > { %v897_v28 = vpop.f32.mrf.mxu0 }
 0x158   : > { %v577_v29 = vmul.f32 %v571_v27, %v428_v25 }
 0x159   : > { %v573_v30 = vpop.f32.mrf.mxu0 }
 0x15a   : > { %v581_v31 = vmul.f32 1.442695, %v577_v29  ;;  %v574_v32 = vadd.f32 %v573_v30, %v525_v24  ;;  %vm579_vm8 = vcmp.gt.f32.partialorder %v577_v29, 20.0 }
 0x15b   : > { %v898_v33 = vpop.f32.mrf.mxu0 }
 0x15c   : > { %932 = vpow2.f32 %v581_v31  ;;  %v578_v34 = vmul.f32 %v885_v23, %v574_v32  ;;  %v706_v32 = vsub.s32 2, %v1053_v20 }
 0x15e   : > { %v583_v35 = vmul.f32 1.442695, %v578_v34  ;;  %vm580_vm9 = vcmp.gt.f32.partialorder %v578_v34, 20.0  ;;  %v707_v33 = vrot.slane %v1059_v22, %v706_v32 }
 0x160   : > { %934 = vpow2.f32 %v583_v35 }
 0x169   : > { %v933_v36 = vpop.eup %932 }
 0x16a   : > { %v585_v37 = vadd.f32 1.0, %v933_v36  ;;  %v588_v40 = vmul.f32 -0.5, %v933_v36  ;;  %v591_v44 = vand.u32 2147483647, %v933_v36 }
 0x16c   : > { %936 = vlog2.f32 %v585_v37  ;;  %v589_v42 = vadd.f32 1.0, %v588_v40  ;;  %vm592_vm6 = vcmp.lt.f32.partialorder %v591_v44, 0.0004427343 }
 0x16d   : > { %v935_v38 = vpop.eup %934 }
 0x16e   : > { %v594_v39 = vadd.f32 1.0, %v935_v38  ;;  %v597_v41 = vmul.f32 -0.5, %v935_v38  ;;  %v600_v47 = vand.u32 2147483647, %v935_v38  ;;  %v590_v48 = vmul.f32 %v933_v36, %v589_v42 }
 0x170   : > { %938 = vlog2.f32 %v594_v39  ;;  %v598_v46 = vadd.f32 1.0, %v597_v41  ;;  %vm601_vm7 = vcmp.lt.f32.partialorder %v600_v47, 0.0004427343 }
 0x172   : > { %v599_v52 = vmul.f32 %v935_v38, %v598_v46 }
 0x179   : > { %v937_v43 = vpop.eup %936 }
 0x17a   : > { %v587_v45 = vmul.f32 0.6931472, %v937_v43 }
 0x17c   : > { %v593_v50 = vsel %vm592_vm6, %v590_v48, %v587_v45 }
 0x17d   : > { %v939_v49 = vpop.eup %938  ;;  %v603_v54 = vsel %vm579_vm8, %v577_v29, %v593_v50 }
 0x17e   : > { %v596_v51 = vmul.f32 0.6931472, %v939_v49 }
 0x180   : > { %v602_v53 = vsel %vm601_vm7, %v599_v52, %v596_v51 }
 0x181   : > { %v604_v55 = vsel %vm580_vm9, %v578_v34, %v602_v53 }
 0x182   : > { %v605_v56 = vpack.c.bf16 %v604_v55, %v603_v54 }
 0x184   : > { %904 = vmatmul.mubr.msk.bf16.vlgmr.msra.gmra.mxu1 %vm626_vm10, %v605_v56 }
 0x244   : > { %v664_v63 = vpop.f32.mrf.mxu1 }
 0x245   : > { %v665_v0 = vadd.f32 %v664_v63, %v613_v61 }
 0x246   : > { %v905_v1 = vpop.f32.mrf.mxu1 }
 0x247   : > { %v671_v2 = vmul.f32 %v665_v0, %v508_v62 }
 0x248   : > { %v667_v3 = vpop.f32.mrf.mxu1 }
 0x249   : > { %v675_v4 = vmul.f32 1.442695, %v671_v2  ;;  %v668_v5 = vadd.f32 %v667_v3, %v613_v61  ;;  %vm673_vm13 = vcmp.gt.f32.partialorder %v671_v2, 20.0 }
 0x24a   : > { %v906_v6 = vpop.f32.mrf.mxu1 }
 0x24b   : > { %940 = vpow2.f32 %v675_v4  ;;  %v672_v7 = vmul.f32 %v892_v60, %v668_v5 }
 0x24d   : > { %v677_v8 = vmul.f32 1.442695, %v672_v7  ;;  %vm674_vm14 = vcmp.gt.f32.partialorder %v672_v7, 20.0 }
 0x24f   : > { %942 = vpow2.f32 %v677_v8 }
 0x258   : > { %v941_v9 = vpop.eup %940 }
 0x259   : > { %v679_v10 = vadd.f32 1.0, %v941_v9  ;;  %v682_v13 = vmul.f32 -0.5, %v941_v9  ;;  %v685_v17 = vand.u32 2147483647, %v941_v9 }
 0x25b   : > { %944 = vlog2.f32 %v679_v10  ;;  %v683_v15 = vadd.f32 1.0, %v682_v13  ;;  %vm686_vm11 = vcmp.lt.f32.partialorder %v685_v17, 0.0004427343 }
 0x25c   : > { %v943_v11 = vpop.eup %942 }
 0x25d   : > { %v688_v12 = vadd.f32 1.0, %v943_v11  ;;  %v691_v14 = vmul.f32 -0.5, %v943_v11  ;;  %v694_v21 = vand.u32 2147483647, %v943_v11  ;;  %v684_v23 = vmul.f32 %v941_v9, %v683_v15 }
 0x25f   : > { %946 = vlog2.f32 %v688_v12  ;;  %v692_v19 = vadd.f32 1.0, %v691_v14  ;;  %vm695_vm12 = vcmp.lt.f32.partialorder %v694_v21, 0.0004427343 }
 0x261   : > { %v693_v27 = vmul.f32 %v943_v11, %v692_v19 }
 0x268   : > { %v945_v16 = vpop.eup %944 }
 0x269   : > { %v681_v18 = vmul.f32 0.6931472, %v945_v16 }
 0x26b   : > { %v687_v25 = vsel %vm686_vm11, %v684_v23, %v681_v18 }
 0x26c   : > { %v947_v24 = vpop.eup %946  ;;  %v697_v29 = vsel %vm673_vm13, %v671_v2, %v687_v25 }
 0x26d   : > { %v690_v26 = vmul.f32 0.6931472, %v947_v24 }
 0x26f   : > { %v696_v28 = vsel %vm695_vm12, %v693_v27, %v690_v26 }
 0x270   : > { %v698_v30 = vsel %vm674_vm14, %v672_v7, %v696_v28 }
 0x271   : > { %v699_v31 = vpack.c.bf16 %v698_v30, %v697_v29 }
 0x273   : > { %912 = vmatmul.mubr.msk.bf16.vlgmr.msra.gmra.mxu0 %vm626_vm10, %v699_v31 }
 0x333   : > { %v757_v34 = vpop.f32.mrf.mxu0 }
 0x334   : > { %v758_v35 = vadd.f32 %v757_v34, %v707_v33 }
 0x335   : > { %v913_v36 = vpop.f32.mrf.mxu0 }
 0x336   : > { %764 = vst.msk [vmem:[%s329_s17] sm:$0xff] %vm532_vm5, %v758_v35 }
 0x337   : > { %v760_v37 = vpop.f32.mrf.mxu0 }
 0x338   : > { %v761_v38 = vadd.f32 %v760_v37, %v707_v33 }
 0x339   : > { %v914_v39 = vpop.f32.mrf.mxu0 }
 0x33a   : > { %765 = vst.msk [vmem:[%s329_s17 + $0x8] sm:$0xff] %vm532_vm5, %v761_v38 }
 0x33b PF: > { %s18_s27 = sadd.s32 1, %s954_s27  }
 0x33c   : > { %p15_p4 = scmp.ge.s32.totalorder %s18_s27, 4  }
 0x33e   :  { %17 = sbr.rel (!%p15_p4) target bundleno = 1 (0x1), region = 85 }

// kernel: tpu_custom_call.1
= control target key start
LH: loop header
LB: loop body
LE: loop exit
PB: predicated region body
PF: predicated region fallthrough
CT: control target
= control target key end

     0   :  { %s1004_s27 = smov 0   ;;  %s1084_s0 = inlined_call_operand.vmem [shape: f32[32,16], index: 0, kind: input, shape index: {}]   ;;  %s1085_s1 = inlined_call_operand.vmem [shape: s32[32,1], index: 1, kind: input, shape index: {}]   ;;  %s1086_s2 = inlined_call_operand.vmem [shape: f32[10,32], index: 2, kind: input, shape index: {}]   ;;  %s1087_s3 = inlined_call_operand.vmem [shape: f32[10,32], index: 3, kind: input, shape index: {}]   ;;  %s1088_s4 = inlined_call_operand.vmem [shape: bf16[16,32], index: 4, kind: input, shape index: {}]   ;;  %s1089_s5 = inlined_call_operand.vmem [shape: bf16[32,32], index: 5, kind: input, shape index: {}]   ;;  %s1090_s6 = inlined_call_operand.vmem [shape: bf16[32,16], index: 6, kind: input, shape index: {}]   ;;  %s1091_s7 = inlined_call_operand.vmem [shape: f32[3,32], index: 7, kind: input, shape index: {}]   ;;  %s1092_s8 = inlined_call_operand.vmem [shape: f32[32,16], index: 8, kind: output, shape index: {}]  }
   0x1 LB: > { %s834_s28 = sadd.s32 4294967295, %s954_s27   ;;  %p838_p0 = scmp.ge.s32.totalorder %s954_s27, 1  ;;  %s954_s27 = sphi %s1004_s27, %s18_s27  }
   0x2   : > { %p274_p1 = scmp.lt.s32.totalorder %s954_s27, 3 }
   0x4   : > { %p275_p2 = pnand %p838_p0, %p274_p1 }
   0x5   : > { %s839_s29 = sshll.u32 (!%p275_p2), %s834_s28, 1 }
   0x6   : > { %278 = sbr.rel (%p275_p2) target bundleno = 827 (0x33b), region = 52  ;;  %p314_p3 = scmp.lt.s32.totalorder (!%p275_p2), %s839_s29, 3 }
   0xb   : > { %v956_v0 = vmov 0   ;;  %s1094_s29 = smov (!%p314_p3, %s839_s29), 3  ;;  %v350_v1 = vld [vmem:[%s1086_s2 + $0x8] sm:$0x3]  ;;  %vm358_vm0 = vcmask 1041408   ;;  %v349_v3 = vld [vmem:[%s1086_s2] sm:$0xff]  ;;  %v335_v8 = vlaneseq }
   0xc   : > { %926 = vset.pattern.permute.xlu0 %v956_v0  ;;  %s1015_s10 = sshll.u32 %s1094_s29, 3  ;;  %879 = vmatprep.subr.msk.mxu0 %vm358_vm0, %v350_v1  ;;  %v438_v2 = vld [vmem:[%s1087_s3 + $0x8] sm:$0x3]  ;;  %v437_v5 = vld [vmem:[%s1087_s3] sm:$0xff]  ;;  %v957_v7 = vmov 0.0   ;;  %vm351_vm1 = vcmask 80896  }
   0xd   : > { %s323_s15 = scalar_lea.vmem %s1085_s1, %s1015_s10  ;;  %880 = vmatpush3.msk.msra.mxu0 %vm358_vm0, %v350_v1  ;;  %886 = vmatprep.subr.msk.mxu1 %vm358_vm0, %v438_v2  ;;  %v336_v9 = vand.u32 127, %v335_v8  ;;  %s317_s22 = scalar_lea.vmem %s1084_s0, %s1015_s10  ;;  %v927_v15 = vld [vmem:[%s1088_s4] sm:$0xff]   ;;  %vm958_vm4 = vmmov 0   ;;  %vm532_vm5 = vcmask 130048   ;;  %v928_v18 = vld [vmem:[%s1089_s5 + $0x8] sm:$0xff]   ;;  %v1053_v20 = vshrl.u32 %v335_v8, 7 }
   0xe   : > { %v333_v4 = vld [vmem:[%s323_s15] sm:$0xff]  ;;  %881 = vmatprep.subr.mxu0 %v349_v3  ;;  %887 = vmatpush3.msk.msra.mxu1 %vm358_vm0, %v438_v2  ;;  %v334_v6 = vld [vmem:[%s323_s15 + $0x8] sm:$0xff]  ;;  %vm626_vm10 = vcmask 261120   ;;  %s329_s17 = scalar_lea.vmem %s1092_s8, %s1015_s10 }
   0xf   : > { %338 = vperm.xlu0 %926, %v333_v4   ;;  %882 = vmatpush3.msra.mxu0 %v349_v3  ;;  %v517_v12 = vld [vmem:[%s317_s22] sm:$0xff]  ;;  %v518_v13 = vld [vmem:[%s317_s22 + $0x8] sm:$0xff]  ;;  %v524_v21 = vsub.s32 0, %v1053_v20  ;;  %v612_v59 = vsub.s32 1, %v1053_v20 }
  0x10   : > { %888 = vmatprep.subr.mxu1 %v437_v5  ;;  %893 = vmatprep.subr.bf16.mxu0 %v957_v7  ;;  %v519_v17 = vpack.c.bf16 %v518_v13, %v517_v12  ;;  %v929_v19 = vld [vmem:[%s1089_s5] sm:$0xff]   ;;  %v930_v57 = vld [vmem:[%s1090_s6 + $0x8] sm:$0xff]  }
  0x11   : > { %889 = vmatpush3.msra.mxu1 %v437_v5  ;;  %v1059_v22 = vld [vmem:[%s1091_s7] sm:$0x7] }
  0x12   : > { %899 = vmatprep.subr.bf16.mxu1 %v957_v7  ;;  %v525_v24 = vrot.slane %v1059_v22, %v524_v21  ;;  %v931_v58 = vld [vmem:[%s1090_s6] sm:$0xff]   ;;  %v613_v61 = vrot.slane %v1059_v22, %v612_v59 }
  0x13   : > { %341 = vperm.xlu0 %926, %v334_v6  }
  0x8a   : > { %v339_v10 = vpop.permute.xlu0 %338 }
  0x8b   : > { %vm343_vm2 = vcmp.eq.s32.totalorder %v339_v10, %v336_v9 }
  0x8c   : > { %v845_v11 = vsel %vm343_vm2, 1.0, %v957_v7 }
  0x8d   : > { %883 = vmatprep.mubr.msk.f32.mxu0 %vm351_vm1, %v845_v11  ;;  %890 = vmatprep.mubr.msk.f32.mxu1 %vm351_vm1, %v845_v11 }
  0x8e   : > { %v342_v14 = vpop.permute.xlu0 %341 }
  0x8f   : > { %vm344_vm3 = vcmp.eq.s32.totalorder %v342_v14, %v336_v9 }
  0x90   : > { %v846_v16 = vsel %vm344_vm3, 1.0, %v957_v7 }
  0x91   : > { %884 = vmatmul.mubr.msk.f32.vlgmr.msra.gmra.mxu0 %vm351_vm1, %v846_v16  ;;  %891 = vmatmul.mubr.msk.f32.vlgmr.msra.gmra.mxu1 %vm351_vm1, %v846_v16 }
  0x92   : > { %894 = vmatpush3.bf16.msra.mxu0 %v927_v15  ;;  %895 = vmatprep.mubr.msk.bf16.mxu0 %vm958_vm4, %v957_v7 }
  0x93   : > { %903 = vmatprep.mubr.msk.bf16.mxu1 %vm958_vm4, %v957_v7  ;;  %907 = vmatprep.subr.bf16.mxu0 %v957_v7 }
  0x94   : > { %900 = vmatpush3.bf16.msra.mxu1 %v928_v18 }
  0x95   : > { %896 = vmatmul.mubr.msk.bf16.vlgmr.msra.gmra.mxu0 %vm532_vm5, %v519_v17  ;;  %901 = vmatprep.subr.bf16.mxu1 %v957_v7 }
  0x96   : > { %911 = vmatprep.mubr.msk.bf16.mxu0 %vm958_vm4, %v957_v7  ;;  %908 = vmatpush3.bf16.msra.mxu0 %v930_v57 }
  0x97   : > { %909 = vmatprep.subr.bf16.mxu0 %v957_v7 }
  0x98   : > { %902 = vmatpush3.bf16.msra.mxu1 %v929_v19 }
  0x9a   : > { %910 = vmatpush3.bf16.msra.mxu0 %v931_v58 }
 0x151   : > { %v885_v23 = vpop.f32.mrf.mxu0  ;;  %v892_v60 = vpop.f32.mrf.mxu1 }
 0x153   : > { %v428_v25 = vpop.f32.mrf.mxu0  ;;  %v508_v62 = vpop.f32.mrf.mxu1 }
 0x155   : > { %v570_v26 = vpop.f32.mrf.mxu0 }
 0x156   : > { %v571_v27 = vadd.f32 %v570_v26, %v525_v24 }
 0x157   : > { %v897_v28 = vpop.f32.mrf.mxu0 }
 0x158   : > { %v577_v29 = vmul.f32 %v571_v27, %v428_v25 }
 0x159   : > { %v573_v30 = vpop.f32.mrf.mxu0 }
 0x15a   : > { %v581_v31 = vmul.f32 1.442695, %v577_v29  ;;  %v574_v32 = vadd.f32 %v573_v30, %v525_v24  ;;  %vm579_vm8 = vcmp.gt.f32.partialorder %v577_v29, 20.0 }
 0x15b   : > { %v898_v33 = vpop.f32.mrf.mxu0 }
 0x15c   : > { %932 = vpow2.f32 %v581_v31  ;;  %v578_v34 = vmul.f32 %v885_v23, %v574_v32  ;;  %v706_v32 = vsub.s32 2, %v1053_v20 }
 0x15e   : > { %v583_v35 = vmul.f32 1.442695, %v578_v34  ;;  %vm580_vm9 = vcmp.gt.f32.partialorder %v578_v34, 20.0  ;;  %v707_v33 = vrot.slane %v1059_v22, %v706_v32 }
 0x160   : > { %934 = vpow2.f32 %v583_v35 }
 0x169   : > { %v933_v36 = vpop.eup %932 }
 0x16a   : > { %v585_v37 = vadd.f32 1.0, %v933_v36  ;;  %v588_v40 = vmul.f32 -0.5, %v933_v36  ;;  %v591_v44 = vand.u32 2147483647, %v933_v36 }
 0x16c   : > { %936 = vlog2.f32 %v585_v37  ;;  %v589_v42 = vadd.f32 1.0, %v588_v40  ;;  %vm592_vm6 = vcmp.lt.f32.partialorder %v591_v44, 0.0004427343 }
 0x16d   : > { %v935_v38 = vpop.eup %934 }
 0x16e   : > { %v594_v39 = vadd.f32 1.0, %v935_v38  ;;  %v597_v41 = vmul.f32 -0.5, %v935_v38  ;;  %v600_v47 = vand.u32 2147483647, %v935_v38  ;;  %v590_v48 = vmul.f32 %v933_v36, %v589_v42 }
 0x170   : > { %938 = vlog2.f32 %v594_v39  ;;  %v598_v46 = vadd.f32 1.0, %v597_v41  ;;  %vm601_vm7 = vcmp.lt.f32.partialorder %v600_v47, 0.0004427343 }
 0x172   : > { %v599_v52 = vmul.f32 %v935_v38, %v598_v46 }
 0x179   : > { %v937_v43 = vpop.eup %936 }
 0x17a   : > { %v587_v45 = vmul.f32 0.6931472, %v937_v43 }
 0x17c   : > { %v593_v50 = vsel %vm592_vm6, %v590_v48, %v587_v45 }
 0x17d   : > { %v939_v49 = vpop.eup %938  ;;  %v603_v54 = vsel %vm579_vm8, %v577_v29, %v593_v50 }
 0x17e   : > { %v596_v51 = vmul.f32 0.6931472, %v939_v49 }
 0x180   : > { %v602_v53 = vsel %vm601_vm7, %v599_v52, %v596_v51 }
 0x181   : > { %v604_v55 = vsel %vm580_vm9, %v578_v34, %v602_v53 }
 0x182   : > { %v605_v56 = vpack.c.bf16 %v604_v55, %v603_v54 }
 0x184   : > { %904 = vmatmul.mubr.msk.bf16.vlgmr.msra.gmra.mxu1 %vm626_vm10, %v605_v56 }
 0x244   : > { %v664_v63 = vpop.f32.mrf.mxu1 }
 0x245   : > { %v665_v0 = vadd.f32 %v664_v63, %v613_v61 }
 0x246   : > { %v905_v1 = vpop.f32.mrf.mxu1 }
 0x247   : > { %v671_v2 = vmul.f32 %v665_v0, %v508_v62 }
 0x248   : > { %v667_v3 = vpop.f32.mrf.mxu1 }
 0x249   : > { %v675_v4 = vmul.f32 1.442695, %v671_v2  ;;  %v668_v5 = vadd.f32 %v667_v3, %v613_v61  ;;  %vm673_vm13 = vcmp.gt.f32.partialorder %v671_v2, 20.0 }
 0x24a   : > { %v906_v6 = vpop.f32.mrf.mxu1 }
 0x24b   : > { %940 = vpow2.f32 %v675_v4  ;;  %v672_v7 = vmul.f32 %v892_v60, %v668_v5 }
 0x24d   : > { %v677_v8 = vmul.f32 1.442695, %v672_v7  ;;  %vm674_vm14 = vcmp.gt.f32.partialorder %v672_v7, 20.0 }
 0x24f   : > { %942 = vpow2.f32 %v677_v8 }
 0x258   : > { %v941_v9 = vpop.eup %940 }
 0x259   : > { %v679_v10 = vadd.f32 1.0, %v941_v9  ;;  %v682_v13 = vmul.f32 -0.5, %v941_v9  ;;  %v685_v17 = vand.u32 2147483647, %v941_v9 }
 0x25b   : > { %944 = vlog2.f32 %v679_v10  ;;  %v683_v15 = vadd.f32 1.0, %v682_v13  ;;  %vm686_vm11 = vcmp.lt.f32.partialorder %v685_v17, 0.0004427343 }
 0x25c   : > { %v943_v11 = vpop.eup %942 }
 0x25d   : > { %v688_v12 = vadd.f32 1.0, %v943_v11  ;;  %v691_v14 = vmul.f32 -0.5, %v943_v11  ;;  %v694_v21 = vand.u32 2147483647, %v943_v11  ;;  %v684_v23 = vmul.f32 %v941_v9, %v683_v15 }
 0x25f   : > { %946 = vlog2.f32 %v688_v12  ;;  %v692_v19 = vadd.f32 1.0, %v691_v14  ;;  %vm695_vm12 = vcmp.lt.f32.partialorder %v694_v21, 0.0004427343 }
 0x261   : > { %v693_v27 = vmul.f32 %v943_v11, %v692_v19 }
 0x268   : > { %v945_v16 = vpop.eup %944 }
 0x269   : > { %v681_v18 = vmul.f32 0.6931472, %v945_v16 }
 0x26b   : > { %v687_v25 = vsel %vm686_vm11, %v684_v23, %v681_v18 }
 0x26c   : > { %v947_v24 = vpop.eup %946  ;;  %v697_v29 = vsel %vm673_vm13, %v671_v2, %v687_v25 }
 0x26d   : > { %v690_v26 = vmul.f32 0.6931472, %v947_v24 }
 0x26f   : > { %v696_v28 = vsel %vm695_vm12, %v693_v27, %v690_v26 }
 0x270   : > { %v698_v30 = vsel %vm674_vm14, %v672_v7, %v696_v28 }
 0x271   : > { %v699_v31 = vpack.c.bf16 %v698_v30, %v697_v29 }
 0x273   : > { %912 = vmatmul.mubr.msk.bf16.vlgmr.msra.gmra.mxu0 %vm626_vm10, %v699_v31 }
 0x333   : > { %v757_v34 = vpop.f32.mrf.mxu0 }
 0x334   : > { %v758_v35 = vadd.f32 %v757_v34, %v707_v33 }
 0x335   : > { %v913_v36 = vpop.f32.mrf.mxu0 }
 0x336   : > { %764 = vst.msk [vmem:[%s329_s17] sm:$0xff] %vm532_vm5, %v758_v35 }
 0x337   : > { %v760_v37 = vpop.f32.mrf.mxu0 }
 0x338   : > { %v761_v38 = vadd.f32 %v760_v37, %v707_v33 }
 0x339   : > { %v914_v39 = vpop.f32.mrf.mxu0 }
 0x33a   : > { %765 = vst.msk [vmem:[%s329_s17 + $0x8] sm:$0xff] %vm532_vm5, %v761_v38 }
 0x33b PF: > { %s18_s27 = sadd.s32 1, %s954_s27  }
 0x33c   : > { %p15_p4 = scmp.ge.s32.totalorder %s18_s27, 4  }
 0x33e   :  { %17 = sbr.rel (!%p15_p4) target bundleno = 1 (0x1), region = 85 }

</bundles_post_ra>
